<compile_context>
chip_gen: v6e
topology: v6e:2x2x1
jax: 0.10.0
libtpu: 0.0.40
codegen_flags: <defaults>
</compile_context>

<pallas_src>
import functools

import jax
import jax.numpy as jnp
from jax.experimental import pallas as pl
from jax.experimental.pallas import tpu as pltpu


def aio_kernel(w_ref, b_ref, x_ref, o_ref):
    # w_ref: (lin, lin)      fused (out_ch, in_ch) weight     (VMEM-resident)
    # b_ref: (lin, 1)        fused bias, broadcast over token lanes
    # x_ref: (lin, TILE_T)   channels x tokens for one (batch, tile) grid point
    # o_ref: (lin, TILE_T)
    acc = jnp.dot(w_ref[...], x_ref[...], preferred_element_type=jnp.float32)
    o_ref[...] = (acc + b_ref[...]).astype(o_ref.dtype)


def aio_layer_forward(x_nchw, w_mlp, b_mlp, w_mmlp, b_mmlp, w_hmlp, b_hmlp,
                      *, mc, hc, tile_t=512):
    """Train-mode AIOLayer forward.

    Weights are (out_ch, in_ch) like squeezed Conv2d 1x1 weights; biases (lin,).
    tile_t = tokens (H*W positions) processed per grid step; rounded to a
    multiple of 128 so output stores are lane-dense.
    """
    N, C, H, W = x_nchw.shape
    lin = mc + hc
    assert C == lin

    # --- set_mhmlp_w(): mask the mixed blocks (matches the PyTorch code) ---
    wm = w_mmlp.at[mc:, :].set(0.0).at[:, mc:].set(0.0)
    wh = w_hmlp.at[:mc, :].set(0.0).at[:, :mc].set(0.0)

    # --- fuse: one weight, one bias (exactly equivalent since x is shared) ---
    w_tot = (w_mlp + wm + wh).astype(x_nchw.dtype)           # (lin, lin)
    b_tot = (b_mlp + b_mmlp + b_hmlp).reshape(lin, 1)         # (lin, 1)
    b_tot = b_tot.astype(jnp.float32)

    # --- layout: NCHW -> (N, C, T), tokens in the lane dimension ---
    T = H * W
    x3d = x_nchw.reshape(N, C, T)

    # Token tile: multiple of 128 (lane-dense), capped by tile_t, covering T.
    t_128 = pl.cdiv(T, 128) * 128
    tile_eff = min(max(tile_t, 128), t_128)
    tile_eff = (tile_eff // 128) * 128
    T_pad = pl.cdiv(T, tile_eff) * tile_eff
    if T_pad != T:
        # ragged token count: pad with zeros once, slice the result afterwards
        x3d = jnp.pad(x3d, ((0, 0), (0, 0), (0, T_pad - T)))

    grid = (N, T_pad // tile_eff)

    cost = pl.CostEstimate(
        flops=2 * N * T_pad * lin * lin,
        transcendentals=0,
        bytes_accessed=x3d.dtype.itemsize * (2 * N * T_pad * lin)
        + 4 * (lin * lin + lin),
    )

    out3d = pl.pallas_call(
        aio_kernel,
        out_shape=jax.ShapeDtypeStruct((N, lin, T_pad), x_nchw.dtype),
        grid_spec=pltpu.PrefetchScalarGridSpec(
            num_scalar_prefetch=0,
            grid=grid,
            in_specs=[
                # constant block index -> weight/bias stay resident in VMEM
                pl.BlockSpec((lin, lin), lambda n, t: (0, 0)),
                pl.BlockSpec((lin, 1), lambda n, t: (0, 0)),
                # batch dim squeezed out; kernel sees (lin, tile_eff)
                pl.BlockSpec((None, lin, tile_eff), lambda n, t: (n, 0, t)),
            ],
            out_specs=pl.BlockSpec((None, lin, tile_eff), lambda n, t: (n, 0, t)),
        ),
        compiler_params=pltpu.CompilerParams(
            dimension_semantics=("parallel", "parallel")),
        cost_estimate=cost,
    )(w_tot, b_tot, x3d)

    if T_pad != T:
        out3d = out3d[:, :, :T]
    return out3d.reshape(N, lin, H, W)


def _xavier_normal(key, out_ch, in_ch):
    # xavier_normal_ for a 1x1 conv: std = gain * sqrt(2 / (fan_in + fan_out)), gain=1
    std = (2.0 / (in_ch + out_ch)) ** 0.5
    return jax.random.normal(key, (out_ch, in_ch), dtype=jnp.float32) * std


def _conv_bias(key, in_ch, lin):
    # default Conv2d bias init: U(-1/sqrt(fan_in), 1/sqrt(fan_in))
    bound = 1.0 / (in_ch ** 0.5)
    return jax.random.uniform(key, (lin,), minval=-bound, maxval=bound,
                              dtype=jnp.float32)


if __name__ == "__main__":
    mc, hc = 16, 16
    lin = mc + hc               # = 32 channels
    N, H, W = 2, 16, 16

    key = jax.random.PRNGKey(0)
    keys = jax.random.split(key, 7)

    x = jax.random.normal(keys[0], (N, lin, H, W), dtype=jnp.float32)

    w_mlp = _xavier_normal(keys[1], lin, lin)
    w_mmlp = _xavier_normal(keys[2], lin, lin)
    w_hmlp = _xavier_normal(keys[3], lin, lin)
    b_mlp = _conv_bias(keys[4], lin, lin)
    b_mmlp = _conv_bias(keys[5], lin, lin)
    b_hmlp = _conv_bias(keys[6], lin, lin)

    fwd = jax.jit(functools.partial(aio_layer_forward, mc=mc, hc=hc))
    out = fwd(x, w_mlp, b_mlp, w_mmlp, b_mmlp, w_hmlp, b_hmlp)
    out = jax.block_until_ready(out)

    # pure-JAX reference of the same train-mode forward (masked 1x1 convs summed)
    wm_ref = w_mmlp.at[mc:, :].set(0.0).at[:, mc:].set(0.0)
    wh_ref = w_hmlp.at[:mc, :].set(0.0).at[:, :mc].set(0.0)
    w_ref_tot = w_mlp + wm_ref + wh_ref
    b_ref_tot = b_mlp + b_mmlp + b_hmlp
    ref = jnp.einsum("nchw,oc->nohw", x, w_ref_tot) + b_ref_tot[None, :, None, None]

    assert out.shape == (N, lin, H, W)
    assert jnp.allclose(out, ref, atol=1e-4, rtol=1e-4)
    print("KERNEL_OK")
</pallas_src>

<mosaic_0001>
module attributes {stable_mosaic.version = 11 : i64} {
  func.func @aio_kernel(%arg0: i32, %arg1: i32, %arg2: memref<32x32xf32, #tpu.memory_space<vmem>>, %arg3: memref<32x1xf32, #tpu.memory_space<vmem>>, %arg4: memref<1x32x256xf32, #tpu.memory_space<vmem>>, %arg5: memref<1x32x256xf32, #tpu.memory_space<vmem>>) attributes {dimension_semantics = [#tpu.dimension_semantics<parallel>, #tpu.dimension_semantics<parallel>], iteration_bounds = array<i64: 2, 1>, scalar_prefetch = 0 : i64, scratch_operands = 0 : i64, tpu.core_type = #tpu.core_type<tc>, window_params = [{pipeline_mode = #tpu.pipeline_mode<synchronous>, transform_indices = @transform_0, window_bounds = array<i64: 32, 32>}, {pipeline_mode = #tpu.pipeline_mode<synchronous>, transform_indices = @transform_1, window_bounds = array<i64: 32, 1>}, {transform_indices = @transform_2, window_bounds = array<i64: 1, 32, 256>}, {transform_indices = @transform_3, window_bounds = array<i64: 1, 32, 256>}]} {
    %c0 = arith.constant 0 : index
    %c0_0 = arith.constant 0 : index
    %0 = vector.load %arg2[%c0, %c0_0] : memref<32x32xf32, #tpu.memory_space<vmem>>, vector<32x32xf32>
    %c0_1 = arith.constant 0 : index
    %c0_2 = arith.constant 0 : index
    %c0_3 = arith.constant 0 : index
    %1 = vector.load %arg4[%c0_1, %c0_2, %c0_3] : memref<1x32x256xf32, #tpu.memory_space<vmem>>, vector<1x32x256xf32>
    %2 = vector.shape_cast %1 : vector<1x32x256xf32> to vector<32x256xf32>
    %cst = arith.constant dense<0.000000e+00> : vector<32x256xf32>
    %3 = tpu.matmul %0, %2, %cst {dimension_numbers = #tpu.dot_dimension_numbers<[1], [0], [0], [1], [0, 0, 1, 1], [], []>} : vector<32x32xf32>, vector<32x256xf32>, vector<32x256xf32> -> vector<32x256xf32>
    %c0_4 = arith.constant 0 : index
    %c0_5 = arith.constant 0 : index
    %4 = vector.load %arg3[%c0_4, %c0_5] : memref<32x1xf32, #tpu.memory_space<vmem>>, vector<32x1xf32>
    %5 = vector.broadcast %4 : vector<32x1xf32> to vector<32x256xf32>
    %6 = arith.addf %3, %5 : vector<32x256xf32>
    %c0_6 = arith.constant 0 : index
    %c0_7 = arith.constant 0 : index
    %c0_8 = arith.constant 0 : index
    %7 = vector.load %arg5[%c0_6, %c0_7, %c0_8] : memref<1x32x256xf32, #tpu.memory_space<vmem>>, vector<1x32x256xf32>
    %8 = vector.shape_cast %7 : vector<1x32x256xf32> to vector<32x256xf32>
    %9 = vector.shape_cast %6 : vector<32x256xf32> to vector<1x32x256xf32>
    tpu.vector_store %arg5[%c0_6, %c0_7, %c0_8], %9 {strides = array<i32>} : memref<1x32x256xf32, #tpu.memory_space<vmem>>, vector<1x32x256xf32>,
    return
  }
  func.func @transform_0(%arg0: i32, %arg1: i32) -> (i32, i32) {
    %c0_i32 = arith.constant 0 : i32
    %c0_i32_0 = arith.constant 0 : i32
    %c0_i32_1 = arith.constant 0 : i32
    return %c0_i32, %c0_i32_0 : i32, i32
  }
  func.func @transform_1(%arg0: i32, %arg1: i32) -> (i32, i32) {
    %c0_i32 = arith.constant 0 : i32
    %c0_i32_0 = arith.constant 0 : i32
    %c0_i32_1 = arith.constant 0 : i32
    return %c0_i32, %c0_i32_0 : i32, i32
  }
  func.func @transform_2(%arg0: i32, %arg1: i32) -> (i32, i32, i32) {
    %c0_i32 = arith.constant 0 : i32
    %c0_i32_0 = arith.constant 0 : i32
    return %arg0, %c0_i32, %arg1 : i32, i32, i32
  }
  func.func @transform_3(%arg0: i32, %arg1: i32) -> (i32, i32, i32) {
    %c0_i32 = arith.constant 0 : i32
    %c0_i32_0 = arith.constant 0 : i32
    return %arg0, %c0_i32, %arg1 : i32, i32, i32
  }
}

</mosaic_0001>

<bundles_post_ra>
// kernel: aio_layer_forward.1
= control target key start
LH: loop header
LB: loop body
LE: loop exit
PB: predicated region body
PF: predicated region fallthrough
CT: control target
= control target key end

     0   :  { %s542_s12 = smov 0   ;;  %s544_s13 = smov 0   ;;  %s610_s0 = inlined_call_operand.vmem [shape: f32[32,32], index: 0, kind: input, shape index: {}]   ;;  %s611_s1 = inlined_call_operand.vmem [shape: f32[32,1], index: 1, kind: input, shape index: {}]   ;;  %s612_s2 = inlined_call_operand.vmem [shape: f32[2,32,256], index: 2, kind: input, shape index: {}]   ;;  %s613_s3 = inlined_call_operand.vmem [shape: f32[2,32,256], index: 3, kind: output, shape index: {}]  }
   0x1   :  { %s546_s14 = smov 0  }
   0x2 LB: > { %s25_s15 = sadd.s32 1, %s514_s13  ;;  %p447_p0 = scmp.ge.s32.totalorder %s518_s14, 1  ;;  %s518_s14 = sphi %s546_s14, %s13_s14   ;;  %s514_s13 = sphi %s544_s13, %s615_s13   ;;  %s510_s12 = sphi %s542_s12, %s614_s12  }
   0x3   : > { %p27_p1 = scmp.ge.s32.totalorder %s25_s15, 2  ;;  %p158_p2 = scmp.lt.s32.totalorder %s518_s14, 3 }
   0x5   : > { %s617_s15 = smov (%p27_p1, %s25_s15), 0  ;;  %p159_p3 = pnand %p447_p0, %p158_p2 }
   0x6   : > { %p191_p4 = scmp.lt.s32.totalorder (!%p159_p3), %s510_s12, 1 }
   0x7   : > { %162 = sbr.rel (%p159_p3) target bundleno = 226 (0xe2), region = 32 }
   0xc   : > { %v520_v0 = vmov 0.0   ;;  %v224_v1 = vld [vmem:[%s611_s1 + $0x10] sm:$0xff]  ;;  %v222_v2 = vld [vmem:[%s611_s1] sm:$0xff]  ;;  %s619_s12 = smov (!%p191_p4, %s510_s12), 1  ;;  %v521_v3 = vmov 0   ;;  %vm246_vm0 = vcmask 261120  }
   0xd   : > { %323 = vmatprep.mubr.f32.mxu0 %v520_v0  ;;  %335 = vmatprep.mubr.f32.mxu1 %v520_v0  ;;  %s458_s20 = sshll.u32 %s619_s12, 6  ;;  %v210_v12 = vld [vmem:[%s610_s0] sm:$0xff]  ;;  %v212_v13 = vld [vmem:[%s610_s0 + $0x10] sm:$0xff]  ;;  %v225_v14 = vld [vmem:[%s611_s1 + $0x18] sm:$0xff] }
   0xe   : > { %495 = vset.pattern.permute.xlu1 %v521_v3  ;;  %494 = vset.pattern.permute.xlu0 %v521_v3  ;;  %s198_s23 = scalar_lea.vmem %s612_s2, %s458_s20  ;;  %v223_v15 = vld [vmem:[%s611_s1 + $0x8] sm:$0xff]  ;;  %v213_v17 = vld [vmem:[%s610_s0 + $0x18] sm:$0xff]  ;;  %s208_s11 = scalar_lea.vmem %s613_s3, %s458_s20 }
   0xf   : > { %238 = vperm.xlu1 %495, %v224_v1   ;;  %228 = vperm.xlu0 %494, %v222_v2   ;;  %v221_v4 = vld [vmem:[%s198_s23 + $0x38] sm:$0xff]  ;;  %v220_v5 = vld [vmem:[%s198_s23 + $0x30] sm:$0xff]  ;;  %v219_v6 = vld [vmem:[%s198_s23 + $0x28] sm:$0xff] }
  0x10   : > { %283 = vmatprep.subr.mxu0 %v221_v4  ;;  %460 = vmatprep.subr.mxu1 %v221_v4  ;;  %v218_v7 = vld [vmem:[%s198_s23 + $0x20] sm:$0xff]  ;;  %v217_v8 = vld [vmem:[%s198_s23 + $0x18] sm:$0xff]  ;;  %v216_v9 = vld [vmem:[%s198_s23 + $0x10] sm:$0xff] }
  0x11   : > { %284 = vmatpush1.msra.mxu0 %v220_v5  ;;  %464 = vmatpush1.msra.mxu1 %v220_v5  ;;  %v215_v10 = vld [vmem:[%s198_s23 + $0x8] sm:$0xff]  ;;  %v214_v11 = vld [vmem:[%s198_s23] sm:$0xff] }
  0x12   : > { %285 = vmatprep.subr.mxu0 %v219_v6  ;;  %461 = vmatprep.subr.mxu1 %v219_v6  ;;  %v211_v16 = vld [vmem:[%s610_s0 + $0x8] sm:$0xff] }
  0x13   : > { %286 = vmatpush1.msra.mxu0 %v218_v7  ;;  %465 = vmatpush1.msra.mxu1 %v218_v7 }
  0x14   : > { %287 = vmatprep.subr.mxu0 %v217_v8  ;;  %462 = vmatprep.subr.mxu1 %v217_v8 }
  0x15   : > { %288 = vmatpush1.msra.mxu0 %v216_v9  ;;  %466 = vmatpush1.msra.mxu1 %v216_v9 }
  0x16   : > { %289 = vmatprep.subr.mxu0 %v215_v10  ;;  %463 = vmatprep.subr.mxu1 %v215_v10 }
  0x17   : > { %290 = vmatpush1.msra.mxu0 %v214_v11  ;;  %467 = vmatpush1.msra.mxu1 %v214_v11 }
  0x18   : > { %452 = vmatmul.mubr.msk.f32.vlgmr.msra.gmra.mxu0 %vm246_vm0, %v210_v12  ;;  %454 = vmatmul.mubr.msk.f32.vlgmr.msra.gmra.mxu1 %vm246_vm0, %v212_v13 }
  0x19   : > { %329 = vmatprep.mubr.f32.mxu0 %v520_v0  ;;  %341 = vmatprep.mubr.f32.mxu1 %v520_v0 }
  0x1a   : > { %243 = vperm.xlu1 %495, %v225_v14   ;;  %233 = vperm.xlu0 %494, %v223_v15  }
  0x1c   : > { %453 = vmatmul.mubr.msk.f32.gmra.mxu0 %vm246_vm0, %v211_v16  ;;  %455 = vmatmul.mubr.msk.f32.gmra.mxu1 %vm246_vm0, %v213_v17 }
  0x8a   : > { %v239_v18 = vpop.permute.xlu1 %238  ;;  %v229_v19 = vpop.permute.xlu0 %228 }
  0x95   : > { %v244_v26 = vpop.permute.xlu1 %243  ;;  %v234_v27 = vpop.permute.xlu0 %233 }
  0xd8   : > { %v325_v20 = vpop.f32.mrf.mxu0  ;;  %v337_v21 = vpop.f32.mrf.mxu1 }
  0xd9   : > { %v326_v22 = vadd.f32 %v325_v20, %v229_v19  ;;  %v338_v23 = vadd.f32 %v337_v21, %v239_v18 }
  0xda   : > { %v327_v24 = vpop.f32.mrf.mxu0  ;;  %v339_v25 = vpop.f32.mrf.mxu1 }
  0xdb   : > { %348 = vst [vmem:[%s208_s11] sm:$0xff] %v326_v22  ;;  %352 = vst [vmem:[%s208_s11 + $0x20] sm:$0xff] %v338_v23  ;;  %v328_v28 = vadd.f32 %v327_v24, %v229_v19  ;;  %v340_v29 = vadd.f32 %v339_v25, %v239_v18 }
  0xdc   : > { %v331_v30 = vpop.f32.mrf.mxu0  ;;  %v343_v31 = vpop.f32.mrf.mxu1 }
  0xdd   : > { %349 = vst [vmem:[%s208_s11 + $0x8] sm:$0xff] %v328_v28  ;;  %353 = vst [vmem:[%s208_s11 + $0x28] sm:$0xff] %v340_v29  ;;  %v332_v32 = vadd.f32 %v331_v30, %v234_v27  ;;  %v344_v33 = vadd.f32 %v343_v31, %v244_v26 }
  0xde   : > { %v333_v34 = vpop.f32.mrf.mxu0  ;;  %v345_v35 = vpop.f32.mrf.mxu1 }
  0xdf   : > { %350 = vst [vmem:[%s208_s11 + $0x10] sm:$0xff] %v332_v32  ;;  %354 = vst [vmem:[%s208_s11 + $0x30] sm:$0xff] %v344_v33  ;;  %v334_v36 = vadd.f32 %v333_v34, %v234_v27  ;;  %v346_v37 = vadd.f32 %v345_v35, %v244_v26 }
  0xe1   : > { %351 = vst [vmem:[%s208_s11 + $0x18] sm:$0xff] %v334_v36  ;;  %355 = vst [vmem:[%s208_s11 + $0x38] sm:$0xff] %v346_v37 }
  0xe2 PF: > { %s13_s14 = sadd.s32 1, %s518_s14   ;;  %s614_s12 = smov %s514_s13 }
  0xe3   : > { %p10_p5 = scmp.ge.s32.totalorder %s13_s14, 4   ;;  %s615_s13 = smov %s617_s15 }
  0xe5   :  { %12 = sbr.rel (!%p10_p5) target bundleno = 2 (0x2), region = 62 }

</bundles_post_ra>
